<compile_context>
chip_gen: v6e
topology: v6e:2x2x1
jax: 0.10.0
libtpu: 0.0.40
codegen_flags: <defaults>
</compile_context>

<pallas_src>
import jax
import jax.numpy as jnp
from jax.experimental import pallas as pl
from jax.experimental.pallas import tpu as pltpu

GATE_CLASSES = 3    # linear_gate: nn.Linear(H, 3)
SPAN_CLASSES = 2    # linear_span: nn.Linear(H, 2)
NUM_STATS = 5       # [span_nll, gate_weighted_nll, gate_weight, value_nll, acc]
_COS_EPS = 1e-8     # torch cosine_similarity eps (clamps each norm)
_NEG_INF = -1e30


def _default_vmem_limit_bytes():
    cap = 128 * 1024 * 1024
    try:
        cap = int(pltpu.get_tpu_info().vmem_capacity_bytes)
    except Exception:
        pass
    # Leave headroom for double-buffering + compiler scratch (v7x has only 64 MiB).
    return int(min(cap * 3 // 4, 100 * 1024 * 1024))


def _dst_slot_kernel(ctx_ref, wcombo_ref, val_sq_ref, bg_ref, bs_ref, gw_ref,
                     lbl_ref, out_ref):
    Bt = ctx_ref.shape[1]
    L = ctx_ref.shape[2]
    H = ctx_ref.shape[3]
    V = val_sq_ref.shape[2]
    N = wcombo_ref.shape[2]                       # GATE_CLASSES + SPAN_CLASSES + V

    ctx = ctx_ref[0]                              # [Bt, L, H] bf16

    # ---- single fused MXU matmul: gate + span + value columns in one weight push ----
    combo = jnp.dot(ctx.reshape(Bt * L, H), wcombo_ref[0],
                    preferred_element_type=jnp.float32)          # [Bt*L, N] f32
    combo3 = combo.reshape(Bt, L, N)
    cls_combo = combo3[:, 0, :]                                  # [Bt, N] (CLS rows)

    lbl = lbl_ref[0]                              # [Bt, 4] int32: gate, value, span0, span1

    # ---------------- gate head: log_softmax + weighted NLL terms --------------------
    gate_logits = cls_combo[:, :GATE_CLASSES] + bg_ref[...]                  # [Bt, 3]
    gm = jnp.max(gate_logits, axis=1, keepdims=True)
    gate_logp = gate_logits - (gm + jnp.log(
        jnp.sum(jnp.exp(gate_logits - gm), axis=1, keepdims=True)))
    giota = jax.lax.broadcasted_iota(jnp.int32, (Bt, GATE_CLASSES), 1)
    gl = lbl[:, 0:1]                                                         # [Bt, 1]
    gate_oh = (giota == gl).astype(jnp.float32)
    w_b = jnp.sum(gate_oh * gw_ref[...], axis=1, keepdims=True)              # [Bt, 1]
    gate_wnll = w_b * (-jnp.sum(gate_oh * gate_logp, axis=1, keepdims=True))  # [Bt, 1]

    # -------- span head: lane-dense [Bt, 2, L] log_softmax over tokens ---------------
    span = jnp.transpose(
        combo3[:, :, GATE_CLASSES:GATE_CLASSES + SPAN_CLASSES], (0, 2, 1))   # [Bt, 2, L]
    span = span + bs_ref[...][None]                                          # + b_span
    tok_iota = jax.lax.broadcasted_iota(jnp.int32, (Bt, SPAN_CLASSES, L), 2)
    span = jnp.where(tok_iota == 0, _NEG_INF, span)     # mask CLS token (torch skips idx 0)
    sm = jnp.max(span, axis=2, keepdims=True)
    span_lp = span - (sm + jnp.log(
        jnp.sum(jnp.exp(span - sm), axis=2, keepdims=True)))                 # [Bt, 2, L]
    s_lbl = lbl[:, 2:4][:, :, None]                                          # [Bt, 2, 1]
    soh = (tok_iota == s_lbl).astype(jnp.float32)
    span_nll = -jnp.sum(jnp.sum(soh * span_lp, axis=2), axis=1, keepdims=True)  # [Bt, 1]

    # ---------------- value head: cosine similarity + NLL terms ----------------------
    cls_f = ctx[:, 0, :].astype(jnp.float32)
    cls_sq = jnp.sum(cls_f * cls_f, axis=1, keepdims=True)                   # [Bt, 1]
    inv_cls_n = jax.lax.rsqrt(jnp.maximum(cls_sq, _COS_EPS * _COS_EPS))      # EUP rsqrt
    inv_val_n = jax.lax.rsqrt(jnp.maximum(val_sq_ref[0], _COS_EPS * _COS_EPS))   # [1, V]
    dots = cls_combo[:, GATE_CLASSES + SPAN_CLASSES:]                        # [Bt, V]
    value_probs = dots * inv_cls_n * inv_val_n                               # cosine sims
    vm = jnp.max(value_probs, axis=1, keepdims=True)
    value_logp = value_probs - (vm + jnp.log(
        jnp.sum(jnp.exp(value_probs - vm), axis=1, keepdims=True)))
    viota = jax.lax.broadcasted_iota(jnp.int32, (Bt, V), 1)
    vl = lbl[:, 1:2]                                                         # [Bt, 1]
    value_oh = (viota == vl).astype(jnp.float32)
    value_nll = -jnp.sum(value_oh * value_logp, axis=1, keepdims=True)       # [Bt, 1]

    # ---------------- slot accuracy ---------------------------------------------------
    gate_pred = jnp.min(jnp.where(gate_logits >= gm, giota, GATE_CLASSES),
                        axis=1, keepdims=True)                               # [Bt, 1]
    acc = jnp.where(gate_pred == gl, 1.0, 0.0)
    pred_value = jnp.min(jnp.where(value_probs >= vm, viota, V),
                         axis=1, keepdims=True)                              # [Bt, 1]
    none_idx = V - 1
    # gate_pred==0 -> 'none' (last value), ==2 -> "don't care" (-1), ==1 -> argmax value
    pred_idx = jnp.where(gate_pred == 0, none_idx,
                         jnp.where(gate_pred == 2, -1, pred_value))
    mismatch = jnp.logical_and(gl == 1, pred_idx != vl)
    acc = jnp.where(mismatch, 0.0, acc)

    out_ref[0] = jnp.concatenate([span_nll, gate_wnll, w_b, value_nll, acc], axis=1)


def dst_forward(ctx_out, val_out, w_gate, b_gate, w_span, b_span, gate_weight,
                gate_label, span_label, value_label, slot_lens,
                *, b_tile=None, vmem_limit_bytes=None):
    """Returns (loss [B], acc [B, S]) matching the torch forward's (loss, acc)."""
    S, B, L, H = ctx_out.shape
    V = val_out.shape[1]
    if b_tile is None:
        b_tile = B
    assert B % b_tile == 0 and (b_tile == B or b_tile % 8 == 0)
    nbt = B // b_tile

    # span label preprocessing (torch: mask==0 stays 0, else += slot_len).  +1 because
    # the kernel log-softmaxes over all L tokens with token 0 masked (no [:, 1:] slice).
    span_mask = span_label == 0                                              # [B, S, 2]
    span_proc = jnp.where(span_mask, 0, span_label + slot_lens[None, :, None]) + 1
    # packed int32 labels: [gate, value, span_start, span_end] -> one DMA stream.
    labels = jnp.concatenate(
        [gate_label[..., None], value_label[..., None], span_proc], axis=2)  # [B, S, 4]
    labels = jnp.transpose(labels, (1, 0, 2)).astype(jnp.int32)              # [S, B, 4]

    # bf16 for the big DMA streams; matmuls accumulate f32 in-kernel.  Value squared
    # norms (cosine denominator) computed from the SAME bf16 values used in the dot.
    ctx_bf = ctx_out.astype(jnp.bfloat16)
    val_bf = val_out.astype(jnp.bfloat16)                                    # [S, V, H]
    val_sq = jnp.sum(jnp.square(val_bf.astype(jnp.float32)), axis=2).reshape(S, 1, V)

    # fused per-slot RHS: [W_gate | W_span | value CLS^T]  -> gate at lanes 0..2.
    wg_b = jnp.broadcast_to(w_gate.astype(jnp.bfloat16)[None], (S, H, GATE_CLASSES))
    ws_b = jnp.broadcast_to(
        jnp.transpose(w_span, (1, 0)).astype(jnp.bfloat16)[None], (S, H, SPAN_CLASSES))
    val_t = jnp.transpose(val_bf, (0, 2, 1))                                 # [S, H, V]
    w_combo = jnp.concatenate([wg_b, ws_b, val_t], axis=2)                   # [S, H, 5+V]
    N = GATE_CLASSES + SPAN_CLASSES + V

    b_gate2 = b_gate.reshape(1, GATE_CLASSES).astype(jnp.float32)
    b_span2 = b_span.reshape(SPAN_CLASSES, 1).astype(jnp.float32)            # sublane-major
    gw2 = gate_weight.reshape(1, GATE_CLASSES).astype(jnp.float32)

    if vmem_limit_bytes is None:
        vmem_limit_bytes = _default_vmem_limit_bytes()

    stats = pl.pallas_call(
        _dst_slot_kernel,
        out_shape=jax.ShapeDtypeStruct((S, B, NUM_STATS), jnp.float32),
        grid=(S, nbt),
        in_specs=[
            pl.BlockSpec((1, b_tile, L, H), lambda s, b: (s, b, 0, 0)),      # ctx (bf16)
            pl.BlockSpec((1, H, N), lambda s, b: (s, 0, 0)),                 # fused RHS
            pl.BlockSpec((1, 1, V), lambda s, b: (s, 0, 0)),                 # value sq norms
            pl.BlockSpec((1, GATE_CLASSES), lambda s, b: (0, 0)),            # b_gate
            pl.BlockSpec((SPAN_CLASSES, 1), lambda s, b: (0, 0)),            # b_span
            pl.BlockSpec((1, GATE_CLASSES), lambda s, b: (0, 0)),            # gate loss weight
            pl.BlockSpec((1, b_tile, 4), lambda s, b: (s, b, 0)),            # packed labels
        ],
        out_specs=pl.BlockSpec((1, b_tile, NUM_STATS), lambda s, b: (s, b, 0)),
        compiler_params=pltpu.CompilerParams(
            dimension_semantics=("parallel", "parallel"),
            vmem_limit_bytes=vmem_limit_bytes,
        ),
    )(ctx_bf, w_combo, val_sq, b_gate2, b_span2, gw2, labels)

    # Finish the torch reductions in the wrapper (per-example partials -> batch means).
    span_nll = stats[:, :, 0]                                                # [S, B]
    loss_gate = jnp.sum(stats[:, :, 1], axis=1) / jnp.sum(stats[:, :, 2], axis=1)   # [S]
    loss_value = jnp.mean(stats[:, :, 3], axis=1)                            # [S]
    # torch: loss_slot = scalar_gate + span_nll[B] + scalar_value ; loss = sum over slots
    loss = jnp.sum(span_nll + loss_gate[:, None] + loss_value[:, None], axis=0)     # [B]
    acc = jnp.transpose(stats[:, :, 4], (1, 0))                              # [B, S]
    return loss, acc


if __name__ == "__main__":
    B, S, L, H, V = 2, 4, 8, 32, 5    # batch, slots, context len, hidden, values per slot
    key = jax.random.PRNGKey(0)
    ks = jax.random.split(key, 8)

    # synthetic encoder outputs (stand-ins for DistilBERT) and labels
    ctx_out = jax.random.normal(ks[0], (S, B, L, H), dtype=jnp.float32)
    val_out = jax.random.normal(ks[1], (S, V, H), dtype=jnp.float32)

    # deterministic parameter init (shapes per nn.Linear(H,3) / nn.Linear(H,2))
    w_gate = 0.1 * jax.random.normal(ks[2], (H, GATE_CLASSES), dtype=jnp.float32)  # W_gate.T
    b_gate = jnp.zeros((GATE_CLASSES,), jnp.float32)
    w_span = 0.1 * jax.random.normal(ks[3], (SPAN_CLASSES, H), dtype=jnp.float32)  # [out, in]
    b_span = jnp.zeros((SPAN_CLASSES,), jnp.float32)
    gate_weight = jnp.array([0.5, 1.0, 1.0], jnp.float32)   # self.gate_loss_weight

    gate_label = jax.random.randint(ks[4], (B, S), 0, GATE_CLASSES)
    span_label = jax.random.randint(ks[5], (B, S, 2), 0, 4)          # raw turn_span
    value_label = jax.random.randint(ks[6], (B, S), 0, V)
    slot_lens = jnp.full((S,), 2, dtype=jnp.int32)                   # tokenized slot lengths

    loss, acc = jax.jit(dst_forward)(ctx_out, val_out, w_gate, b_gate, w_span, b_span,
                                     gate_weight, gate_label, span_label, value_label,
                                     slot_lens)
    jax.block_until_ready((loss, acc))
    assert loss.shape == (B,) and acc.shape == (B, S)
    assert bool(jnp.all(jnp.isfinite(loss)))
    print("KERNEL_OK")
</pallas_src>

<mosaic_0001>
module attributes {stable_mosaic.version = 11 : i64} {
  func.func @_dst_slot_kernel(%arg0: i32, %arg1: i32, %arg2: memref<1x2x8x32xbf16, #tpu.memory_space<vmem>>, %arg3: memref<1x32x10xbf16, #tpu.memory_space<vmem>>, %arg4: memref<1x1x5xf32, #tpu.memory_space<vmem>>, %arg5: memref<1x3xf32, #tpu.memory_space<vmem>>, %arg6: memref<2x1xf32, #tpu.memory_space<vmem>>, %arg7: memref<1x3xf32, #tpu.memory_space<vmem>>, %arg8: memref<1x2x4xi32, #tpu.memory_space<vmem>>, %arg9: memref<1x2x5xf32, #tpu.memory_space<vmem>>) attributes {dimension_semantics = [#tpu.dimension_semantics<parallel>, #tpu.dimension_semantics<parallel>], iteration_bounds = array<i64: 4, 1>, scalar_prefetch = 0 : i64, scratch_operands = 0 : i64, tpu.core_type = #tpu.core_type<tc>, window_params = [{transform_indices = @transform_0, window_bounds = array<i64: 1, 2, 8, 32>}, {transform_indices = @transform_1, window_bounds = array<i64: 1, 32, 10>}, {transform_indices = @transform_2, window_bounds = array<i64: 1, 1, 5>}, {pipeline_mode = #tpu.pipeline_mode<synchronous>, transform_indices = @transform_3, window_bounds = array<i64: 1, 3>}, {pipeline_mode = #tpu.pipeline_mode<synchronous>, transform_indices = @transform_4, window_bounds = array<i64: 2, 1>}, {pipeline_mode = #tpu.pipeline_mode<synchronous>, transform_indices = @transform_5, window_bounds = array<i64: 1, 3>}, {transform_indices = @transform_6, window_bounds = array<i64: 1, 2, 4>}, {transform_indices = @transform_7, window_bounds = array<i64: 1, 2, 5>}]} {
    %c0 = arith.constant 0 : index
    %c0_0 = arith.constant 0 : index
    %c0_1 = arith.constant 0 : index
    %c0_2 = arith.constant 0 : index
    %0 = vector.load %arg2[%c0, %c0_0, %c0_1, %c0_2] : memref<1x2x8x32xbf16, #tpu.memory_space<vmem>>, vector<1x2x8x32xbf16>
    %1 = vector.shape_cast %0 : vector<1x2x8x32xbf16> to vector<2x8x32xbf16>
    %2 = vector.shape_cast %1 : vector<2x8x32xbf16> to vector<16x32xbf16>
    %c0_3 = arith.constant 0 : index
    %c0_4 = arith.constant 0 : index
    %c0_5 = arith.constant 0 : index
    %3 = vector.load %arg3[%c0_3, %c0_4, %c0_5] : memref<1x32x10xbf16, #tpu.memory_space<vmem>>, vector<1x32x10xbf16>
    %4 = vector.shape_cast %3 : vector<1x32x10xbf16> to vector<32x10xbf16>
    %cst = arith.constant dense<0.000000e+00> : vector<16x10xf32>
    %5 = tpu.matmul %2, %4, %cst {dimension_numbers = #tpu.dot_dimension_numbers<[1], [0], [0], [1], [0, 0, 1, 1], [], []>} : vector<16x32xbf16>, vector<32x10xbf16>, vector<16x10xf32> -> vector<16x10xf32>
    %6 = vector.shape_cast %5 : vector<16x10xf32> to vector<2x8x10xf32>
    %7 = vector.extract_strided_slice %6 {offsets = [0, 0, 0], sizes = [2, 1, 10], strides = [1, 1, 1]} : vector<2x8x10xf32> to vector<2x1x10xf32>
    %8 = vector.shape_cast %7 : vector<2x1x10xf32> to vector<2x10xf32>
    %c0_6 = arith.constant 0 : index
    %c0_7 = arith.constant 0 : index
    %c0_8 = arith.constant 0 : index
    %9 = vector.load %arg8[%c0_6, %c0_7, %c0_8] : memref<1x2x4xi32, #tpu.memory_space<vmem>>, vector<1x2x4xi32>
    %10 = vector.shape_cast %9 : vector<1x2x4xi32> to vector<2x4xi32>
    %11 = vector.extract_strided_slice %8 {offsets = [0, 0], sizes = [2, 3], strides = [1, 1]} : vector<2x10xf32> to vector<2x3xf32>
    %c0_9 = arith.constant 0 : index
    %c0_10 = arith.constant 0 : index
    %12 = vector.load %arg5[%c0_9, %c0_10] : memref<1x3xf32, #tpu.memory_space<vmem>>, vector<1x3xf32>
    %13 = vector.broadcast %12 : vector<1x3xf32> to vector<2x3xf32>
    %14 = arith.addf %11, %13 : vector<2x3xf32>
    %cst_11 = arith.constant dense<0xFF800000> : vector<2xf32>
    %15 = vector.multi_reduction <maximumf>, %14, %cst_11 [1] : vector<2x3xf32> to vector<2xf32>
    %16 = vector.shape_cast %15 : vector<2xf32> to vector<2x1xf32>
    %17 = vector.broadcast %16 : vector<2x1xf32> to vector<2x3xf32>
    %18 = arith.subf %14, %17 : vector<2x3xf32>
    %19 = math.exp %18 : vector<2x3xf32>
    %cst_12 = arith.constant dense<0.000000e+00> : vector<2xf32>
    %20 = vector.multi_reduction <add>, %19, %cst_12 [1] : vector<2x3xf32> to vector<2xf32>
    %21 = vector.shape_cast %20 : vector<2xf32> to vector<2x1xf32>
    %22 = math.log %21 : vector<2x1xf32>
    %23 = arith.addf %16, %22 : vector<2x1xf32>
    %24 = vector.broadcast %23 : vector<2x1xf32> to vector<2x3xf32>
    %25 = arith.subf %14, %24 : vector<2x3xf32>
    %26 = tpu.iota {dimensions = array<i32: 1>} : vector<2x3xi32>
    %27 = vector.extract_strided_slice %10 {offsets = [0, 0], sizes = [2, 1], strides = [1, 1]} : vector<2x4xi32> to vector<2x1xi32>
    %28 = vector.broadcast %27 : vector<2x1xi32> to vector<2x3xi32>
    %29 = arith.cmpi eq, %26, %28 : vector<2x3xi32>
    %30 = arith.extui %29 : vector<2x3xi1> to vector<2x3xi32>
    %31 = arith.sitofp %30 : vector<2x3xi32> to vector<2x3xf32>
    %c0_13 = arith.constant 0 : index
    %c0_14 = arith.constant 0 : index
    %32 = vector.load %arg7[%c0_13, %c0_14] : memref<1x3xf32, #tpu.memory_space<vmem>>, vector<1x3xf32>
    %33 = vector.broadcast %32 : vector<1x3xf32> to vector<2x3xf32>
    %34 = arith.mulf %31, %33 : vector<2x3xf32>
    %cst_15 = arith.constant dense<0.000000e+00> : vector<2xf32>
    %35 = vector.multi_reduction <add>, %34, %cst_15 [1] : vector<2x3xf32> to vector<2xf32>
    %36 = vector.shape_cast %35 : vector<2xf32> to vector<2x1xf32>
    %37 = arith.mulf %31, %25 : vector<2x3xf32>
    %cst_16 = arith.constant dense<0.000000e+00> : vector<2xf32>
    %38 = vector.multi_reduction <add>, %37, %cst_16 [1] : vector<2x3xf32> to vector<2xf32>
    %39 = vector.shape_cast %38 : vector<2xf32> to vector<2x1xf32>
    %cst_17 = arith.constant 0.000000e+00 : f32
    %40 = vector.broadcast %cst_17 : f32 to vector<2x1xf32>
    %41 = arith.subf %40, %39 : vector<2x1xf32>
    %42 = arith.mulf %36, %41 : vector<2x1xf32>
    %43 = vector.extract_strided_slice %6 {offsets = [0, 0, 3], sizes = [2, 8, 2], strides = [1, 1, 1]} : vector<2x8x10xf32> to vector<2x8x2xf32>
    %44 = tpu.transpose %43, [0, 2, 1] : vector<2x8x2xf32> -> vector<2x2x8xf32>
    %c0_18 = arith.constant 0 : index
    %c0_19 = arith.constant 0 : index
    %45 = vector.load %arg6[%c0_18, %c0_19] : memref<2x1xf32, #tpu.memory_space<vmem>>, vector<2x1xf32>
    %46 = vector.shape_cast %45 : vector<2x1xf32> to vector<1x2x1xf32>
    %47 = vector.broadcast %46 : vector<1x2x1xf32> to vector<2x2x8xf32>
    %48 = arith.addf %44, %47 : vector<2x2x8xf32>
    %49 = tpu.iota {dimensions = array<i32: 2>} : vector<2x2x8xi32>
    %c0_i32 = arith.constant 0 : i32
    %50 = vector.broadcast %c0_i32 : i32 to vector<2x2x8xi32>
    %51 = arith.cmpi eq, %49, %50 : vector<2x2x8xi32>
    %cst_20 = arith.constant -1.000000e+30 : f32
    %52 = vector.broadcast %cst_20 : f32 to vector<2x2x8xf32>
    %53 = arith.select %51, %52, %48 : vector<2x2x8xi1>, vector<2x2x8xf32>
    %cst_21 = arith.constant dense<0xFF800000> : vector<2x2xf32>
    %54 = vector.multi_reduction <maximumf>, %53, %cst_21 [2] : vector<2x2x8xf32> to vector<2x2xf32>
    %55 = vector.shape_cast %54 : vector<2x2xf32> to vector<2x2x1xf32>
    %56 = vector.broadcast %55 : vector<2x2x1xf32> to vector<2x2x8xf32>
    %57 = arith.subf %53, %56 : vector<2x2x8xf32>
    %58 = math.exp %57 : vector<2x2x8xf32>
    %cst_22 = arith.constant dense<0.000000e+00> : vector<2x2xf32>
    %59 = vector.multi_reduction <add>, %58, %cst_22 [2] : vector<2x2x8xf32> to vector<2x2xf32>
    %60 = vector.shape_cast %59 : vector<2x2xf32> to vector<2x2x1xf32>
    %61 = math.log %60 : vector<2x2x1xf32>
    %62 = arith.addf %55, %61 : vector<2x2x1xf32>
    %63 = vector.broadcast %62 : vector<2x2x1xf32> to vector<2x2x8xf32>
    %64 = arith.subf %53, %63 : vector<2x2x8xf32>
    %65 = vector.extract_strided_slice %10 {offsets = [0, 2], sizes = [2, 2], strides = [1, 1]} : vector<2x4xi32> to vector<2x2xi32>
    %66 = vector.shape_cast %65 : vector<2x2xi32> to vector<2x2x1xi32>
    %67 = vector.broadcast %66 : vector<2x2x1xi32> to vector<2x2x8xi32>
    %68 = arith.cmpi eq, %49, %67 : vector<2x2x8xi32>
    %69 = arith.extui %68 : vector<2x2x8xi1> to vector<2x2x8xi32>
    %70 = arith.sitofp %69 : vector<2x2x8xi32> to vector<2x2x8xf32>
    %71 = arith.mulf %70, %64 : vector<2x2x8xf32>
    %cst_23 = arith.constant dense<0.000000e+00> : vector<2x2xf32>
    %72 = vector.multi_reduction <add>, %71, %cst_23 [2] : vector<2x2x8xf32> to vector<2x2xf32>
    %cst_24 = arith.constant dense<0.000000e+00> : vector<2xf32>
    %73 = vector.multi_reduction <add>, %72, %cst_24 [1] : vector<2x2xf32> to vector<2xf32>
    %74 = vector.shape_cast %73 : vector<2xf32> to vector<2x1xf32>
    %cst_25 = arith.constant 0.000000e+00 : f32
    %75 = vector.broadcast %cst_25 : f32 to vector<2x1xf32>
    %76 = arith.subf %75, %74 : vector<2x1xf32>
    %77 = vector.extract_strided_slice %1 {offsets = [0, 0, 0], sizes = [2, 1, 32], strides = [1, 1, 1]} : vector<2x8x32xbf16> to vector<2x1x32xbf16>
    %78 = vector.shape_cast %77 : vector<2x1x32xbf16> to vector<2x32xbf16>
    %79 = arith.extf %78 : vector<2x32xbf16> to vector<2x32xf32>
    %80 = arith.mulf %79, %79 : vector<2x32xf32>
    %cst_26 = arith.constant dense<0.000000e+00> : vector<2xf32>
    %81 = vector.multi_reduction <add>, %80, %cst_26 [1] : vector<2x32xf32> to vector<2xf32>
    %82 = vector.shape_cast %81 : vector<2xf32> to vector<2x1xf32>
    %cst_27 = arith.constant 1.000000e-16 : f32
    %83 = vector.broadcast %cst_27 : f32 to vector<2x1xf32>
    %84 = arith.maximumf %82, %83 : vector<2x1xf32>
    %85 = math.rsqrt %84 : vector<2x1xf32>
    %c0_28 = arith.constant 0 : index
    %c0_29 = arith.constant 0 : index
    %c0_30 = arith.constant 0 : index
    %86 = vector.load %arg4[%c0_28, %c0_29, %c0_30] : memref<1x1x5xf32, #tpu.memory_space<vmem>>, vector<1x1x5xf32>
    %87 = vector.shape_cast %86 : vector<1x1x5xf32> to vector<1x5xf32>
    %cst_31 = arith.constant 1.000000e-16 : f32
    %88 = vector.broadcast %cst_31 : f32 to vector<1x5xf32>
    %89 = arith.maximumf %87, %88 : vector<1x5xf32>
    %90 = math.rsqrt %89 : vector<1x5xf32>
    %91 = vector.extract_strided_slice %8 {offsets = [0, 5], sizes = [2, 5], strides = [1, 1]} : vector<2x10xf32> to vector<2x5xf32>
    %92 = vector.broadcast %85 : vector<2x1xf32> to vector<2x5xf32>
    %93 = arith.mulf %91, %92 : vector<2x5xf32>
    %94 = vector.broadcast %90 : vector<1x5xf32> to vector<2x5xf32>
    %95 = arith.mulf %93, %94 : vector<2x5xf32>
    %cst_32 = arith.constant dense<0xFF800000> : vector<2xf32>
    %96 = vector.multi_reduction <maximumf>, %95, %cst_32 [1] : vector<2x5xf32> to vector<2xf32>
    %97 = vector.shape_cast %96 : vector<2xf32> to vector<2x1xf32>
    %98 = vector.broadcast %97 : vector<2x1xf32> to vector<2x5xf32>
    %99 = arith.subf %95, %98 : vector<2x5xf32>
    %100 = math.exp %99 : vector<2x5xf32>
    %cst_33 = arith.constant dense<0.000000e+00> : vector<2xf32>
    %101 = vector.multi_reduction <add>, %100, %cst_33 [1] : vector<2x5xf32> to vector<2xf32>
    %102 = vector.shape_cast %101 : vector<2xf32> to vector<2x1xf32>
    %103 = math.log %102 : vector<2x1xf32>
    %104 = arith.addf %97, %103 : vector<2x1xf32>
    %105 = vector.broadcast %104 : vector<2x1xf32> to vector<2x5xf32>
    %106 = arith.subf %95, %105 : vector<2x5xf32>
    %107 = tpu.iota {dimensions = array<i32: 1>} : vector<2x5xi32>
    %108 = vector.extract_strided_slice %10 {offsets = [0, 1], sizes = [2, 1], strides = [1, 1]} : vector<2x4xi32> to vector<2x1xi32>
    %109 = vector.broadcast %108 : vector<2x1xi32> to vector<2x5xi32>
    %110 = arith.cmpi eq, %107, %109 : vector<2x5xi32>
    %111 = arith.extui %110 : vector<2x5xi1> to vector<2x5xi32>
    %112 = arith.sitofp %111 : vector<2x5xi32> to vector<2x5xf32>
    %113 = arith.mulf %112, %106 : vector<2x5xf32>
    %cst_34 = arith.constant dense<0.000000e+00> : vector<2xf32>
    %114 = vector.multi_reduction <add>, %113, %cst_34 [1] : vector<2x5xf32> to vector<2xf32>
    %115 = vector.shape_cast %114 : vector<2xf32> to vector<2x1xf32>
    %cst_35 = arith.constant 0.000000e+00 : f32
    %116 = vector.broadcast %cst_35 : f32 to vector<2x1xf32>
    %117 = arith.subf %116, %115 : vector<2x1xf32>
    %118 = vector.broadcast %16 : vector<2x1xf32> to vector<2x3xf32>
    %119 = arith.cmpf oge, %14, %118 : vector<2x3xf32>
    %c3_i32 = arith.constant 3 : i32
    %120 = vector.broadcast %c3_i32 : i32 to vector<2x3xi32>
    %121 = arith.select %119, %26, %120 : vector<2x3xi1>, vector<2x3xi32>
    %cst_36 = arith.constant dense<2147483647> : vector<2xi32>
    %122 = vector.multi_reduction <minsi>, %121, %cst_36 [1] : vector<2x3xi32> to vector<2xi32>
    %123 = vector.shape_cast %122 : vector<2xi32> to vector<2x1xi32>
    %124 = arith.cmpi eq, %123, %27 : vector<2x1xi32>
    %cst_37 = arith.constant 1.000000e+00 : f32
    %cst_38 = arith.constant 0.000000e+00 : f32
    %125 = vector.broadcast %cst_37 : f32 to vector<2x1xf32>
    %126 = vector.broadcast %cst_38 : f32 to vector<2x1xf32>
    %127 = arith.select %124, %125, %126 : vector<2x1xi1>, vector<2x1xf32>
    %128 = vector.broadcast %97 : vector<2x1xf32> to vector<2x5xf32>
    %129 = arith.cmpf oge, %95, %128 : vector<2x5xf32>
    %c5_i32 = arith.constant 5 : i32
    %130 = vector.broadcast %c5_i32 : i32 to vector<2x5xi32>
    %131 = arith.select %129, %107, %130 : vector<2x5xi1>, vector<2x5xi32>
    %cst_39 = arith.constant dense<2147483647> : vector<2xi32>
    %132 = vector.multi_reduction <minsi>, %131, %cst_39 [1] : vector<2x5xi32> to vector<2xi32>
    %133 = vector.shape_cast %132 : vector<2xi32> to vector<2x1xi32>
    %c0_i32_40 = arith.constant 0 : i32
    %134 = vector.broadcast %c0_i32_40 : i32 to vector<2x1xi32>
    %135 = arith.cmpi eq, %123, %134 : vector<2x1xi32>
    %c2_i32 = arith.constant 2 : i32
    %136 = vector.broadcast %c2_i32 : i32 to vector<2x1xi32>
    %137 = arith.cmpi eq, %123, %136 : vector<2x1xi32>
    %c-1_i32 = arith.constant -1 : i32
    %138 = vector.broadcast %c-1_i32 : i32 to vector<2x1xi32>
    %139 = arith.select %137, %138, %133 : vector<2x1xi1>, vector<2x1xi32>
    %c4_i32 = arith.constant 4 : i32
    %140 = vector.broadcast %c4_i32 : i32 to vector<2x1xi32>
    %141 = arith.select %135, %140, %139 : vector<2x1xi1>, vector<2x1xi32>
    %c1_i32 = arith.constant 1 : i32
    %142 = vector.broadcast %c1_i32 : i32 to vector<2x1xi32>
    %143 = arith.cmpi eq, %27, %142 : vector<2x1xi32>
    %144 = arith.cmpi ne, %141, %108 : vector<2x1xi32>
    %145 = arith.andi %143, %144 : vector<2x1xi1>
    %cst_41 = arith.constant 0.000000e+00 : f32
    %146 = vector.broadcast %cst_41 : f32 to vector<2x1xf32>
    %147 = arith.select %145, %146, %127 : vector<2x1xi1>, vector<2x1xf32>
    %148 = tpu.concatenate %76, %42, %36, %117, %147 in 1 : vector<2x1xf32>, vector<2x1xf32>, vector<2x1xf32>, vector<2x1xf32>, vector<2x1xf32> -> vector<2x5xf32>
    %c0_42 = arith.constant 0 : index
    %c0_43 = arith.constant 0 : index
    %c0_44 = arith.constant 0 : index
    %149 = vector.load %arg9[%c0_42, %c0_43, %c0_44] : memref<1x2x5xf32, #tpu.memory_space<vmem>>, vector<1x2x5xf32>
    %150 = vector.shape_cast %149 : vector<1x2x5xf32> to vector<2x5xf32>
    %151 = vector.shape_cast %148 : vector<2x5xf32> to vector<1x2x5xf32>
    tpu.vector_store %arg9[%c0_42, %c0_43, %c0_44], %151 {strides = array<i32>} : memref<1x2x5xf32, #tpu.memory_space<vmem>>, vector<1x2x5xf32>,
    return
  }
  func.func @transform_0(%arg0: i32, %arg1: i32) -> (i32, i32, i32, i32) {
    %c0_i32 = arith.constant 0 : i32
    %c0_i32_0 = arith.constant 0 : i32
    %c0_i32_1 = arith.constant 0 : i32
    return %arg0, %arg1, %c0_i32, %c0_i32_0 : i32, i32, i32, i32
  }
  func.func @transform_1(%arg0: i32, %arg1: i32) -> (i32, i32, i32) {
    %c0_i32 = arith.constant 0 : i32
    %c0_i32_0 = arith.constant 0 : i32
    %c0_i32_1 = arith.constant 0 : i32
    return %arg0, %c0_i32, %c0_i32_0 : i32, i32, i32
  }
  func.func @transform_2(%arg0: i32, %arg1: i32) -> (i32, i32, i32) {
    %c0_i32 = arith.constant 0 : i32
    %c0_i32_0 = arith.constant 0 : i32
    %c0_i32_1 = arith.constant 0 : i32
    return %arg0, %c0_i32, %c0_i32_0 : i32, i32, i32
  }
  func.func @transform_3(%arg0: i32, %arg1: i32) -> (i32, i32) {
    %c0_i32 = arith.constant 0 : i32
    %c0_i32_0 = arith.constant 0 : i32
    %c0_i32_1 = arith.constant 0 : i32
    return %c0_i32, %c0_i32_0 : i32, i32
  }
  func.func @transform_4(%arg0: i32, %arg1: i32) -> (i32, i32) {
    %c0_i32 = arith.constant 0 : i32
    %c0_i32_0 = arith.constant 0 : i32
    %c0_i32_1 = arith.constant 0 : i32
    return %c0_i32, %c0_i32_0 : i32, i32
  }
  func.func @transform_5(%arg0: i32, %arg1: i32) -> (i32, i32) {
    %c0_i32 = arith.constant 0 : i32
    %c0_i32_0 = arith.constant 0 : i32
    %c0_i32_1 = arith.constant 0 : i32
    return %c0_i32, %c0_i32_0 : i32, i32
  }
  func.func @transform_6(%arg0: i32, %arg1: i32) -> (i32, i32, i32) {
    %c0_i32 = arith.constant 0 : i32
    %c0_i32_0 = arith.constant 0 : i32
    return %arg0, %arg1, %c0_i32 : i32, i32, i32
  }
  func.func @transform_7(%arg0: i32, %arg1: i32) -> (i32, i32, i32) {
    %c0_i32 = arith.constant 0 : i32
    %c0_i32_0 = arith.constant 0 : i32
    return %arg0, %arg1, %c0_i32 : i32, i32, i32
  }
}

</mosaic_0001>

<bundles_post_ra>
// kernel: div.5
= control target key start
LH: loop header
LB: loop body
LE: loop exit
PB: predicated region body
PF: predicated region fallthrough
CT: control target
= control target key end

     0   :  { %s37_s0 = inlined_call_operand.vmem [shape: f32[4], index: 0, kind: input, shape index: {}]   ;;  %s38_s1 = inlined_call_operand.vmem [shape: f32[4], index: 1, kind: input, shape index: {}]   ;;  %s39_s2 = inlined_call_operand.vmem [shape: f32[4], index: 2, kind: output, shape index: {}]  }
   0x1   :  { %v4_v0 = vld [vmem:[%s38_s1] sm:$0x1] }
   0x2   :  { %11 = vrcp.f32 %v4_v0  ;;  %v3_v1 = vld [vmem:[%s37_s0] sm:$0x1] }
   0xf   :  { %v12_v2 = vpop.eup %11 }
  0x10   :  { %v8_v3 = vmul.f32 %v12_v2, %v3_v1 }
  0x12   :  { %10 = vst [vmem:[%s39_s2] sm:$0x1] %v8_v3 }

// kernel: dst_forward.1
= control target key start
LH: loop header
LB: loop body
LE: loop exit
PB: predicated region body
PF: predicated region fallthrough
CT: control target
= control target key end

     0   :  { %s1127_s24 = smov 0   ;;  %s1129_s25 = smov 0   ;;  %s1318_s0 = inlined_call_operand.vmem [shape: bf16[4,2,8,32], index: 0, kind: input, shape index: {}]   ;;  %s1319_s1 = inlined_call_operand.vmem [shape: bf16[4,32,10], index: 1, kind: input, shape index: {}]   ;;  %s1320_s2 = inlined_call_operand.vmem [shape: f32[4,1,5], index: 2, kind: input, shape index: {}]   ;;  %s1321_s3 = inlined_call_operand.vmem [shape: f32[1,3], index: 3, kind: input, shape index: {}]   ;;  %s1322_s4 = inlined_call_operand.vmem [shape: f32[2,1], index: 4, kind: input, shape index: {}]   ;;  %s1323_s5 = inlined_call_operand.vmem [shape: f32[1,3], index: 5, kind: input, shape index: {}]   ;;  %s1324_s6 = inlined_call_operand.vmem [shape: s32[4,2,4], index: 6, kind: input, shape index: {}]   ;;  %s1325_s7 = inlined_call_operand.vmem [shape: f32[4,2,5], index: 7, kind: output, shape index: {}]  }
   0x1   :  { %s1131_s26 = smov 0  }
   0x2 LB: > { %s29_s27 = sadd.s32 1, %s1072_s25  ;;  %p957_p0 = scmp.ge.s32.totalorder %s1076_s26, 1  ;;  %s1076_s26 = sphi %s1131_s26, %s17_s26   ;;  %s1072_s25 = sphi %s1129_s25, %s1327_s25   ;;  %s1068_s24 = sphi %s1127_s24, %s1326_s24  }
   0x3   : > { %p31_p1 = scmp.ge.s32.totalorder %s29_s27, 4  ;;  %p290_p2 = scmp.lt.s32.totalorder %s1076_s26, 5 }
   0x5   : > { %s1329_s27 = smov (%p31_p1, %s29_s27), 0  ;;  %p291_p3 = pnand %p957_p0, %p290_p2 }
   0x6   : > { %p344_p4 = scmp.lt.s32.totalorder (!%p291_p3), %s1068_s24, 3  ;;  %s1081_s18 = smov (!%p291_p3), 5  }
   0x7   : > { %294 = sbr.rel (%p291_p3) target bundleno = 1093 (0x445), region = 48  ;;  %s1082_s19 = smov (!%p291_p3), 125  }
   0x8   : > { %s1083_s22 = smov (!%p291_p3), 123   ;;  %s1085_s8 = smov (!%p291_p3), 127  }
   0x9   : > { %s1086_s11 = smov (!%p291_p3), 4  }
   0xc   : > { %v1078_v0 = vmov 0.0   ;;  %vm1079_vm0 = vmmov 0   ;;  %s1331_s24 = smov (!%p344_p4, %s1068_s24), 3  ;;  %vm399_vm1 = vcmask 261120   ;;  %vm457_vm2 = vcmask 1041409  }
   0xd   : > { %981 = vmatprep.subr.bf16.mxu0 %v1078_v0  ;;  %985 = vmatprep.mubr.msk.bf16.mxu0 %vm1079_vm0, %v1078_v0  ;;  %s977_s28 = sshll.u32 %s1331_s24, 4  ;;  %s976_s29 = sshll.u32 %s1331_s24, 3  ;;  %vm687_vm3 = vcmask 254976   ;;  %v491_v13 = vlaneseq  ;;  %v593_v15 = vld [vmem:[%s1322_s4] sm:$0x3]  ;;  %v1080_v16 = vmov 0  }
   0xe   : > { %s357_s9 = scalar_lea.vmem %s1319_s1, %s977_s28  ;;  %s351_s12 = scalar_lea.vmem %s1318_s0, %s976_s29  ;;  %1022 = vset.pattern.permute.xlu1 %v1080_v16  ;;  %vm717_vm4 = vcmask 74792   ;;  %v968_v40 = vld [vmem:[%s1321_s3] ss:$0 sm:$0xff]  ;;  %vm460_vm5 = vcmask 17408   ;;  %vm604_vm7 = vcmask 58368   ;;  %vm738_vm12 = vcmask 33792  }
   0xf   : > { %v1026_v1 = vld [vmem:[%s357_s9 + $0x8] sm:$0xff]   ;;  %v1027_v2 = vld [vmem:[%s357_s9] sm:$0xff]   ;;  %s360_s15 = scalar_lea.vmem %s1320_s2, %s1331_s24  ;;  %v1163_v14 = vshrl.u32 %v491_v13, 7  ;;  %596 = vperm.xlu1 %1022, %v593_v15   ;;  %v1181_v39 = vand.u32 127, %v491_v13  ;;  %s962_s23 = sshll.u32 %s1331_s24, 1 }
  0x10   : > { %982 = vmatpush3.bf16.msra.mxu0 %v1026_v1  ;;  %v376_v3 = vld [vmem:[%s351_s12] sm:$0xff]   ;;  %s367_s30 = scalar_lea.vmem %s1324_s6, %s962_s23  ;;  %s374_s14 = scalar_lea.vmem %s1325_s7, %s962_s23 }
  0x11   : > { %983 = vmatprep.subr.bf16.mxu0 %v1078_v0  ;;  %v678_v4 = vunpack.c.l.bf16 %v376_v3  ;;  %v679_v5 = vunpack.c.h.bf16 %v376_v3  ;;  %v693_v8 = vld [vmem:[%s360_s15] sm:$0x1]  ;;  %v633_v17 = vsub.s32 0, %v1163_v14  ;;  %vm601_vm6 = vcmp.eq.s32.totalorder %v1181_v39, 0 }
  0x12   : > { %v694_v11 = vmax.f32 %v693_v8, 1e-16 }
  0x13   : > { %v680_v6 = vmul.f32 %v678_v4, %v678_v4  ;;  %v681_v7 = vmul.f32 %v679_v5, %v679_v5 }
  0x14   : > { %984 = vmatpush3.bf16.msra.mxu0 %v1027_v2  ;;  %1030 = vrsqrt.f32 %v694_v11 }
  0x15   : > { %v684_v9 = vrot.slane %v681_v7, 7 }
  0x17   : > { %986 = vmatmul.mubr.msk.bf16.vlgmr.msra.gmra.mxu0 %vm399_vm1, %v376_v3  ;;  %v685_v10 = vsel %vm457_vm2, %v684_v9, %v680_v6 }
  0x18   : > { %v688_v12 = vsel %vm687_vm3, %v685_v10, 0.0 }
  0x19   : > { %689 = vadd.xlane.f32.xlu0 %v688_v12 }
  0x21   : > { %v1031_v18 = vpop.eup %1030 }
  0x22   : > { %v706_v19 = vrot.slane %v1031_v18, %v633_v17 }
  0x2f   : > { %707 = vrot.lane.b32.xlu0 %v706_v19, %s1081_s18 }
  0x8a   : > { %v597_v36 = vpop.permute.xlu1 %596 }
  0xa2   : > { %v690_v20 = vpop.xlane.xlu0 %689 }
  0xa3   : > { %v691_v23 = vmax.f32 %v690_v20, 1e-16 }
  0xa5   : > { %1032 = vrsqrt.f32 %v691_v23 }
  0xa6   : > { %v708_v29 = vpop.permute.xlu0 %707 }
  0xb2   : > { %v1033_v26 = vpop.eup %1032 }
  0xb3   : > { %v697_v27 = vrot.slane %v1033_v26, 1 }
  0xd7   : > { %v437_v21 = vpop.f32.mrf.mxu0 }
  0xd8   : > { %523 = vrot.lane.b32.xlu1 %v437_v21, %s1082_s19  ;;  %v700_v31 = vmul.f32 %v1033_v26, %v437_v21  ;;  %v1191_v43 = vadd.f32 %v968_v40, %v437_v21 }
  0xd9   : > { %v987_v22 = vpop.f32.mrf.mxu0 }
  0xda   : > { %v1176_v33 = vmul.f32 %v708_v29, %v700_v31 }
  0xdb   : > { %v440_v24 = vpop.f32.mrf.mxu0 }
  0xdc   : > { %525 = vrot.lane.b32.xlu1 %v440_v24, %s1082_s19  ;;  %v701_v28 = vmul.f32 %v697_v27, %v440_v24  ;;  %v1186_v41 = vadd.f32 %v968_v40, %v440_v24 }
  0xdd   : > { %v988_v25 = vpop.f32.mrf.mxu0 }
  0xde   : > { %v1173_v30 = vmul.f32 %v708_v29, %v701_v28  ;;  %v456_v42 = vrot.slane %v1186_v41, 7 }
  0xe0   : > { %v714_v32 = vrot.slane %v1173_v30, 7  ;;  %v458_v44 = vsel %vm457_vm2, %v456_v42, %v1191_v43 }
  0xe1   : > { %v461_v45 = vsel %vm460_vm5, %v458_v44, -inf }
  0xe2   : > { %v715_v34 = vsel %vm457_vm2, %v714_v32, %v1176_v33 }
  0xe3   : > { %v718_v35 = vsel %vm717_vm4, %v715_v34, -inf }
 0x100   : > { %719 = vmax.xlane.f32.xlu1 %v718_v35  ;;  %v1084_v35 = vmov 1  }
 0x14a   : > { %v524_v37 = vpop.permute.xlu1 %523 }
 0x14b   : > { %529 = vxpose.xlu0.b32.start.end [1/1] (short) (narrow) %v524_v37, 8  ;;  %v641_v37 = vsub.s32 1, %v1163_v14 }
 0x14e   : > { %v526_v38 = vpop.permute.xlu1 %525 }
 0x14f   : > { %561 = vxpose.xlu1.b32.start.end [1/1] (short) (narrow) %v526_v38, 8 }
 0x16d   : > { %794 = vrot.lane.b32.xlu1 %v1181_v39, %s1081_s18 }
 0x16e   : > { %1024 = vset.pattern.permute.xlu1 %v1084_v35 }
 0x174   : > { %1023 = vset.pattern.permute.xlu0 %v1080_v16 }
 0x178   : > { %462 = vmax.xlane.f32.xlu0 %v461_v45 }
 0x189   : > { %v1197_v46 = vpop.xlane.xlu1 %719 }
 0x18a   : > { %v722_v47 = vrot.slane %v1197_v46, 1  ;;  %v725_v57 = vsub.f32 %v1176_v33, %v1197_v46  ;;  %vm792_vm9 = vcmp.ge.f32.partialorder %v1176_v33, %v1197_v46 }
 0x18c   : > { %v726_v50 = vsub.f32 %v1173_v30, %v722_v47  ;;  %v727_v59 = vmul.f32 1.442695, %v725_v57  ;;  %vm793_vm8 = vcmp.ge.f32.partialorder %v1173_v30, %v722_v47 }
 0x18e   : > { %v729_v55 = vmul.f32 1.442695, %v726_v50 }
 0x190   : > { %1034 = vpow2.f32 %v729_v55 }
 0x191   : > { %1036 = vpow2.f32 %v727_v59 }
 0x19d   : > { %v1035_v60 = vpop.eup %1034 }
 0x19e   : > { %v733_v61 = vrot.slane %v1035_v60, 7  ;;  %v1037_v62 = vpop.eup %1036 }
 0x1a0   : > { %v734_v63 = vsel %vm457_vm2, %v733_v61, %v1037_v62 }
 0x1c7   : > { %v545_v48 = vpop.trf.xlu0 }
 0x1c8   : > { %v599_v49 = vadd.f32 %v597_v36, %v545_v48 }
 0x1ca   : > { %v1202_v51 = vsel %vm601_vm6, -1e+30, %v599_v49 }
 0x1cb   : > { %v577_v52 = vpop.trf.xlu1  ;;  %v605_v53 = vsel %vm604_vm7, %v1202_v51, -inf }
 0x1cc   : > { %v600_v54 = vadd.f32 %v597_v36, %v577_v52  ;;  %606 = vmax.xlane.f32.xlu0 %v605_v53  ;;  %v1247_v36 = vld [vmem:[%s367_s30] sm:$0x3] }
 0x1cd   : > { %v634_v38 = vrot.slane %v1247_v36, %v633_v17  ;;  %v642_v40 = vrot.slane %v1247_v36, %v641_v37 }
 0x1ce   : > { %v1206_v56 = vsel %vm601_vm6, -1e+30, %v600_v54 }
 0x1cf   : > { %v608_v58 = vsel %vm604_vm7, %v1206_v56, -inf }
 0x1d0   : > { %609 = vmax.xlane.f32.xlu0 %v608_v58 }
 0x1df   : > { %v795_v1 = vpop.permute.xlu1 %794 }
 0x1e0   : > { %v797_v2 = vsel %vm793_vm8, %v795_v1, 5  ;;  %v796_v4 = vsel %vm792_vm9, %v795_v1, 5  ;;  %vm673_vm8 = vcmask 9216   ;;  %vm819_vm9 = vcmp.eq.s32.totalorder %v1247_v36, 1 }
 0x1e1   : > { %v798_v3 = vrot.slane %v797_v2, 7 }
 0x1e3   : > { %v799_v5 = vsel %vm457_vm2, %v798_v3, %v796_v4 }
 0x1e4   : > { %v800_v6 = vsel %vm717_vm4, %v799_v5, 2147483647 }
 0x1e5   : > { %v802_v7 = vshra.s32 %v800_v6, 16  ;;  %v801_v49 = vand.u32 65535, %v800_v6 }
 0x1e6   : > { %735 = vrot.lane.b32.xlu0 %v734_v63, %s1083_s22 }
 0x1e7   : > { %v804_v10 = vcvt.s32.f32 %v802_v7  ;;  %v803_v52 = vcvt.s32.f32 %v801_v49 }
 0x201   : > { %v1219_v8 = vpop.xlane.xlu0 %462 }
 0x202   : > { %v465_v9 = vrot.slane %v1219_v8, 1  ;;  %vm769_vm10 = vcmp.ge.f32.partialorder %v1191_v43, %v1219_v8  ;;  %v468_v45 = vsub.f32 %v1191_v43, %v1219_v8 }
 0x203   : > { %v771_v13 = vsel %vm769_vm10, %v1181_v39, 3 }
 0x204   : > { %vm770_vm11 = vcmp.ge.f32.partialorder %v1186_v41, %v465_v9  ;;  %v469_v42 = vsub.f32 %v1186_v41, %v465_v9  ;;  %v470_v47 = vmul.f32 1.442695, %v468_v45 }
 0x205   : > { %805 = vmin.xlane.f32.xlu0 %v804_v10  ;;  %v772_v11 = vsel %vm770_vm11, %v1181_v39, 3 }
 0x206   : > { %v773_v12 = vrot.slane %v772_v11, 7  ;;  %v472_v44 = vmul.f32 1.442695, %v469_v42 }
 0x208   : > { %v774_v15 = vsel %vm457_vm2, %v773_v12, %v771_v13 }
 0x209   : > { %v775_v18 = vsel %vm460_vm5, %v774_v15, 2147483647 }
 0x20a   : > { %v777_v19 = vshra.s32 %v775_v18, 16  ;;  %v776_v53 = vand.u32 65535, %v775_v18 }
 0x20c   : > { %v779_v20 = vcvt.s32.f32 %v777_v19  ;;  %v778_v57 = vcvt.s32.f32 %v776_v53 }
 0x20e   : > { %780 = vmin.xlane.f32.xlu1 %v779_v20 }
 0x255   : > { %v1229_v21 = vpop.xlane.xlu0 %606 }
 0x256   : > { %v611_v22 = vsub.f32 %v1202_v51, %v1229_v21 }
 0x258   : > { %v613_v23 = vmul.f32 1.442695, %v611_v22 }
 0x259   : > { %v1233_v24 = vpop.xlane.xlu0 %609 }
 0x25a   : > { %1038 = vpow2.f32 %v613_v23  ;;  %v612_v25 = vsub.f32 %v1206_v56, %v1233_v24 }
 0x25c   : > { %v615_v26 = vmul.f32 1.442695, %v612_v25 }
 0x25d   : > { %v736_v27 = vpop.permute.xlu0 %735 }
 0x25e   : > { %1040 = vpow2.f32 %v615_v26  ;;  %v739_v28 = vsel %vm738_vm12, %v736_v27, 0.0 }
 0x25f   : > { %740 = vadd.xlane.f32.xlu0 %v739_v28  ;;  %1042 = vpow2.f32 %v472_v44 }
 0x260   : > { %1044 = vpow2.f32 %v470_v47 }
 0x267   : > { %v1039_v29 = vpop.eup %1038 }
 0x268   : > { %v617_v31 = vsel %vm604_vm7, %v1039_v29, 0.0 }
 0x269   : > { %618 = vadd.xlane.f32.xlu0 %v617_v31 }
 0x26b   : > { %v1041_v32 = vpop.eup %1040 }
 0x26c   : > { %v620_v34 = vsel %vm604_vm7, %v1041_v32, 0.0  ;;  %v1043_v50 = vpop.eup %1042 }
 0x26d   : > { %621 = vadd.xlane.f32.xlu1 %v620_v34  ;;  %v476_v55 = vrot.slane %v1043_v50, 7  ;;  %v1045_v58 = vpop.eup %1044 }
 0x26f   : > { %v477_v60 = vsel %vm457_vm2, %v476_v55, %v1045_v58 }
 0x270   : > { %v479_v61 = vsel %vm460_vm5, %v477_v60, 0.0 }
 0x27e   : > { %637 = vbcast.lane.b32.xlu1 %v634_v38, 258 }
 0x27f   : > { %645 = vbcast.lane.b32.xlu0 %v642_v40, 258 }
 0x28e   : > { %v1257_v48 = vpop.xlane.xlu0 %805 }
 0x28f   : > { %vm807_vm13 = vcmp.eq.f32.partialorder %v804_v10, %v1257_v48  ;;  %v812_v29 = vcvt.f32.s32 %v1257_v48 }
 0x290   : > { %v808_v54 = vsel %vm807_vm13, %v803_v52, inf  ;;  %vm833_vm13 = vcmask 15360  }
 0x291   : > { %v813_v37 = vshll.u32 %v812_v29, 16 }
 0x297   : > { %v781_v17 = vpop.xlane.xlu1 %780 }
 0x298   : > { %vm782_vm14 = vcmp.eq.f32.partialorder %v779_v20, %v781_v17  ;;  %v787_v27 = vcvt.f32.s32 %v781_v17 }
 0x299   : > { %v783_v59 = vsel %vm782_vm14, %v778_v57, inf  ;;  %vm835_vm14 = vcmask 23552  }
 0x29a   : > { %v788_v32 = vshll.u32 %v787_v27, 16 }
 0x29e   : > { %809 = vmin.xlane.f32.xlu0 %v808_v54 }
 0x2a2   : > { %784 = vmin.xlane.f32.xlu1 %v783_v59 }
 0x2a6   : > { %480 = vadd.xlane.f32.xlu1 %v479_v61 }
 0x2b7   : > { %752 = vperm.xlu1 %1024, %v1247_v36  }
 0x2e8   : > { %v741_v62 = vpop.xlane.xlu0 %740 }
 0x2e9   : > { %1046 = vlog2.f32 %v741_v62 }
 0x2f2   : > { %v619_v63 = vpop.xlane.xlu0 %618 }
 0x2f3   : > { %1048 = vlog2.f32 %v619_v63 }
 0x2f6   : > { %v1047_v1 = vpop.eup %1046  ;;  %v622_v4 = vpop.xlane.xlu1 %621 }
 0x2f7   : > { %v743_v2 = vmul.f32 0.6931472, %v1047_v1  ;;  %1050 = vlog2.f32 %v622_v4  ;;  %v646_v22 = vpop.permute.xlu0 %645  ;;  %v665_v1 = vsub.s32 %v1181_v39, %v1163_v14 }
 0x2f8   : > { %vm648_vm0 = vcmp.eq.s32.totalorder %v1181_v39, %v646_v22 }
 0x2f9   : > { %v744_v3 = vadd.f32 %v743_v2, %v1197_v46 }
 0x2fa   : > { %v638_v7 = vpop.permute.xlu1 %637 }
 0x2fb   : > { %v746_v5 = vrot.slane %v744_v3, 1  ;;  %v749_v9 = vsub.f32 %v1176_v33, %v744_v3  ;;  %vm647_vm15 = vcmp.eq.s32.totalorder %v1181_v39, %v638_v7 }
 0x2fc   : > { %v971_v46 = vsel %vm647_vm15, 1.0, %v1078_v0  ;;  %vm837_vm15 = vcmask 31744  }
 0x2fd   : > { %v750_v6 = vsub.f32 %v1173_v30, %v746_v5 }
 0x2ff   : > { %v759_v10 = vrot.slane %v750_v6, 7 }
 0x300   : > { %v1049_v11 = vpop.eup %1048 }
 0x301   : > { %v624_v12 = vmul.f32 0.6931472, %v1049_v11  ;;  %v760_v13 = vsel %vm457_vm2, %v759_v10, %v749_v9 }
 0x302   : > { %761 = vrot.lane.b32.xlu1 %v760_v13, %s1083_s22 }
 0x303   : > { %v627_v15 = vadd.f32 %v624_v12, %v1229_v21  ;;  %v972_v21 = vsel %vm648_vm0, 1.0, %v1078_v0 }
 0x304   : > { %v1051_v33 = vpop.eup %1050 }
 0x305   : > { %v629_v18 = vsub.f32 %v1202_v51, %v627_v15  ;;  %v626_v20 = vmul.f32 0.6931472, %v1051_v33 }
 0x307   : > { %v653_v30 = vmul.f32 %v971_v46, %v629_v18  ;;  %v628_v23 = vadd.f32 %v626_v20, %v1233_v24 }
 0x309   : > { %v655_v19 = vsel %vm604_vm7, %v653_v30, 0.0  ;;  %v630_v25 = vsub.f32 %v1206_v56, %v628_v23 }
 0x30a   : > { %656 = vadd.xlane.f32.xlu0 %v655_v19 }
 0x30b   : > { %v654_v26 = vmul.f32 %v972_v21, %v630_v25 }
 0x30d   : > { %v658_v51 = vsel %vm604_vm7, %v654_v26, 0.0 }
 0x320   : > { %494 = vperm.xlu0 %1023, %v1247_v36  }
 0x324   : > { %1025 = vset.pattern.permute.xlu0 %v1084_v35 }
 0x326   : > { %659 = vadd.xlane.f32.xlu1 %v658_v51 }
 0x327   : > { %v810_v28 = vpop.xlane.xlu0 %809 }
 0x328   : > { %v811_v31 = vcvt.f32.s32 %v810_v28 }
 0x32a   : > { %v814_v38 = vadd.s32 %v813_v37, %v811_v31 }
 0x32b   : > { %v785_v24 = vpop.xlane.xlu1 %784 }
 0x32c   : > { %v786_v34 = vcvt.f32.s32 %v785_v24 }
 0x32e   : > { %v789_v56 = vadd.s32 %v788_v32, %v786_v34 }
 0x32f   : > { %v481_v44 = vpop.xlane.xlu1 %480 }
 0x330   : > { %vm815_vm1 = vcmp.eq.s32.totalorder %v789_v56, 0  ;;  %vm816_vm3 = vcmp.eq.s32.totalorder %v789_v56, 2  ;;  %1052 = vlog2.f32 %v481_v44  ;;  %vm790_vm10 = vcmp.eq.s32.totalorder %v789_v56, %v1247_v36 }
 0x331   : > { %v817_v40 = vsel %vm816_vm3, 4294967295, %v814_v38  ;;  %v791_v9 = vsel %vm790_vm10, 1.0, %v1078_v0 }
 0x332   : > { %v818_v42 = vsel %vm815_vm1, 4, %v817_v40 }
 0x333   : > { %vm820_vm4 = vcmp.ne.s32.totalorder %v818_v42, %v1247_v36  ;;  %v753_v17 = vpop.permute.xlu1 %752 }
 0x334   : > { %v821_v35 = vsel %vm820_vm4, 1, %v1080_v16  ;;  %vm754_vm6 = vcmp.eq.s32.totalorder %v1181_v39, %v753_v17  ;;  %v970_v16 = vld [vmem:[%s1323_s5] ss:$0 sm:$0xff] }
 0x335   : > { %v973_v57 = vsel %vm754_vm6, 1.0, %v1078_v0 }
 0x337   : > { %822 = vrot.lane.b32.xlu1 %v821_v35, %s1085_s8 }
 0x33d   : > { %v1053_v45 = vpop.eup %1052 }
 0x33e   : > { %v483_v47 = vmul.f32 0.6931472, %v1053_v45 }
 0x340   : > { %v484_v48 = vadd.f32 %v483_v47, %v1219_v8 }
 0x342   : > { %v486_v49 = vrot.slane %v484_v48, 1  ;;  %v489_v55 = vsub.f32 %v1191_v43, %v484_v48 }
 0x344   : > { %v490_v50 = vsub.f32 %v1186_v41, %v486_v49 }
 0x346   : > { %v512_v53 = vrot.slane %v490_v50, 7 }
 0x348   : > { %v513_v41 = vsel %vm457_vm2, %v512_v53, %v489_v55 }
 0x374   : > { %v762_v8 = vpop.permute.xlu1 %761 }
 0x375   : > { %v764_v61 = vmul.f32 %v973_v57, %v762_v8 }
 0x377   : > { %v765_v63 = vsel %vm738_vm12, %v764_v61, 0.0 }
 0x393   : > { %v657_v52 = vpop.xlane.xlu0 %656 }
 0x394   : > { %v666_v3 = vrot.slane %v657_v52, %v665_v1 }
 0x39b   : > { %v495_v54 = vpop.permute.xlu0 %494 }
 0x39c   : > { %vm496_vm7 = vcmp.eq.s32.totalorder %v1181_v39, %v495_v54 }
 0x39d   : > { %v969_v58 = vsel %vm496_vm7, 1.0, %v1078_v0 }
 0x39e   : > { %v515_v59 = vmul.f32 %v969_v58, %v513_v41  ;;  %v506_v60 = vmul.f32 %v970_v16, %v969_v58 }
 0x3a0   : > { %v516_v62 = vsel %vm460_vm5, %v515_v59, 0.0  ;;  %v507_v43 = vsel %vm460_vm5, %v506_v60, 0.0 }
 0x3a1   : > { %517 = vadd.xlane.f32.xlu1 %v516_v62  ;;  %508 = vadd.xlane.f32.xlu0 %v507_v43 }
 0x3a5   : > { %766 = vadd.xlane.f32.xlu1 %v765_v63 }
 0x3af   : > { %v660_v2 = vpop.xlane.xlu1 %659 }
 0x3b0   : > { %v670_v4 = vrot.slane %v660_v2, %v665_v1 }
 0x3b2   : > { %v671_v5 = vsel %vm457_vm2, %v670_v4, %v666_v3  ;;  %vm831_vm2 = vcmask 7168  }
 0x3b3   : > { %v674_v6 = vsel %vm673_vm8, %v671_v5, 0.0  ;;  %v823_v7 = vpop.permute.xlu1 %822 }
 0x3b4   : > { %675 = vadd.xlane.f32.xlu1 %v674_v6  ;;  %vm824_vm5 = vcmp.ne.s32.totalorder %v823_v7, 0 }
 0x3b5   : > { %vm825_vm11 = vmand %vm819_vm9, %vm824_vm5 }
 0x3b6   : > { %v826_v10 = vsel %vm825_vm11, 0.0, %v791_v9 }
 0x3c5   : > { %828 = vrot.lane.b32.xlu1 %v826_v10, %s1086_s11 }
 0x42a   : > { %v518_v14 = vpop.xlane.xlu1 %517  ;;  %v509_v12 = vpop.xlane.xlu0 %508 }
 0x42b   : > { %v519_v11 = vsub.f32 0.0, %v518_v14 }
 0x42d   : > { %v520_v15 = vmul.f32 %v519_v11, %v509_v12 }
 0x42e   : > { %v767_v39 = vpop.xlane.xlu1 %766 }
 0x42f   : > { %v768_v18 = vsub.f32 0.0, %v767_v39 }
 0x43d   : > { %v676_v13 = vpop.xlane.xlu1 %675 }
 0x43e   : > { %v677_v46 = vsub.f32 0.0, %v676_v13 }
 0x440   : > { %v832_v30 = vsel %vm831_vm2, %v677_v46, %v520_v15 }
 0x441   : > { %v829_v0 = vpop.permute.xlu1 %828  ;;  %v834_v36 = vsel %vm833_vm13, %v832_v30, %v509_v12 }
 0x442   : > { %v836_v19 = vsel %vm835_vm14, %v834_v36, %v768_v18 }
 0x443   : > { %v838_v33 = vsel %vm837_vm15, %v836_v19, %v829_v0 }
 0x444   : > { %839 = vst.msk [vmem:[%s374_s14] sm:$0x3] %vm738_vm12, %v838_v33 }
 0x445 PF: > { %s17_s26 = sadd.s32 1, %s1076_s26   ;;  %s1326_s24 = smov %s1072_s25 }
 0x446   : > { %p14_p5 = scmp.ge.s32.totalorder %s17_s26, 6   ;;  %s1327_s25 = smov %s1329_s27 }
 0x448   :  { %16 = sbr.rel (!%p14_p5) target bundleno = 2 (0x2), region = 87 }

</bundles_post_ra>
